<compile_context>
chip_gen: v7x
topology: tpu7x:2x2x1
jax: 0.10.0
libtpu: 0.0.40
codegen_flags: <defaults>
</compile_context>

<pallas_src>
import functools

import jax
import jax.numpy as jnp
from jax.experimental import pallas as pl
from jax.experimental.pallas import tpu as pltpu

LANES = 128
MAX_TILE_ROWS = 8192  # 8192 * 128 * 4 B = 4 MiB per f32 stream per tile


def _bce_loss_terms(x, t, smoothing):
    """Numerically stable BCE-with-logits with label smoothing (matches torch)."""
    t = t * (1.0 - smoothing) + 0.5 * smoothing
    #   loss = max(x, 0) - x*t + log1p(exp(-|x|))
    return jnp.maximum(x, 0.0) - x * t + jnp.log1p(jnp.exp(-jnp.abs(x)))


def _bce_smooth_sum_kernel(logits_ref, targets_ref, out_ref, acc_ref, *,
                           smoothing, tile_rows, valid_rows_last, need_mask):
    i = pl.program_id(0)
    last = pl.num_programs(0) - 1

    @pl.when(i == 0)
    def _():
        acc_ref[...] = jnp.zeros_like(acc_ref)

    x = logits_ref[...].astype(jnp.float32)
    t = targets_ref[...].astype(jnp.float32)
    loss = _bce_loss_terms(x, t, smoothing)

    if need_mask:
        # Steady-state blocks: unmasked accumulate (no mask VALU work).
        @pl.when(i < last)
        def _():
            acc_ref[...] += jnp.sum(loss, axis=0, keepdims=True)

        # Last block only: mask the ragged rows with a constant-threshold
        # row-iota compare; jnp.where (select) is NaN/inf safe for garbage
        # reads beyond the array bounds.
        @pl.when(i == last)
        def _():
            row_ids = jax.lax.broadcasted_iota(jnp.int32, (tile_rows, LANES), 0)
            masked = jnp.where(row_ids < valid_rows_last, loss, 0.0)
            acc_ref[...] += jnp.sum(masked, axis=0, keepdims=True)
    else:
        acc_ref[...] += jnp.sum(loss, axis=0, keepdims=True)

    @pl.when(i == last)
    def _():
        # Cross-lane reduce once, in the epilogue. Kernel emits the SUM over
        # the bulk slab; the wrapper divides by the true element count.
        out_ref[...] = jnp.sum(acc_ref[...], axis=1, keepdims=True)


def bce_with_logits_loss_smoothing(logits, targets, smoothing=0.1):
    """Mean BCE-with-logits loss with label smoothing. Returns a scalar f32."""
    assert logits.shape == targets.shape
    smoothing = float(smoothing)
    n_elems = logits.size

    x = logits.reshape(-1)
    t = targets.reshape(-1)

    rem = n_elems % LANES
    n_bulk = n_elems - rem

    tail_sum = None
    if rem:
        # Fold the <128-element ragged tail in plain JAX instead of padding
        # (a full-array jnp.pad would cost an extra HBM read+write of both
        # inputs). No-op for the aligned common case.
        xt = x[n_bulk:].astype(jnp.float32)
        tt = t[n_bulk:].astype(jnp.float32)
        tail_sum = jnp.sum(_bce_loss_terms(xt, tt, smoothing))
        x = x[:n_bulk]
        t = t[:n_bulk]

    if n_bulk == 0:
        # Tiny all-tail input.
        return tail_sum / jnp.float32(n_elems)

    rows = n_bulk // LANES
    x2 = x.reshape(rows, LANES)
    t2 = t.reshape(rows, LANES)

    # Tile rows: one full-extent block for small inputs, otherwise big
    # sublane-aligned tiles; a ragged last block is masked in-kernel.
    tile_rows = rows if rows <= MAX_TILE_ROWS else MAX_TILE_ROWS
    num_blocks = int(pl.cdiv(rows, tile_rows))
    need_mask = (num_blocks * tile_rows != rows)
    valid_rows_last = rows - (num_blocks - 1) * tile_rows  # compile-time const

    kernel = functools.partial(
        _bce_smooth_sum_kernel,
        smoothing=smoothing,
        tile_rows=int(tile_rows),
        valid_rows_last=int(valid_rows_last),
        need_mask=bool(need_mask),
    )

    in_spec = pl.BlockSpec((tile_rows, LANES), lambda i: (i, 0))

    out = pl.pallas_call(
        kernel,
        out_shape=jax.ShapeDtypeStruct((1, 1), jnp.float32),
        grid_spec=pltpu.PrefetchScalarGridSpec(
            num_scalar_prefetch=0,
            grid=(num_blocks,),
            in_specs=[in_spec, in_spec],
            out_specs=pl.BlockSpec((1, 1), lambda i: (0, 0)),
            scratch_shapes=[pltpu.VMEM((1, LANES), jnp.float32)],
        ),
        compiler_params=pltpu.CompilerParams(
            dimension_semantics=("arbitrary",),  # sequential reduction axis
            vmem_limit_bytes=32 * 1024 * 1024,
        ),
    )(x2, t2)

    total = out[0, 0]
    if tail_sum is not None:
        total = total + tail_sum
    return total / jnp.float32(n_elems)


def _reference(logits, targets, smoothing=0.1):
    t = targets * (1.0 - smoothing) + 0.5 * smoothing
    x = logits
    loss = jnp.maximum(x, 0.0) - x * t + jnp.log1p(jnp.exp(-jnp.abs(x)))
    return jnp.mean(loss)


if __name__ == "__main__":
    key = jax.random.PRNGKey(0)
    k1, k2 = jax.random.split(key)
    # shapes consistent with a U-Net segmentation head: NCHW logits + targets
    logits = jax.random.normal(k1, (2, 4, 16, 16), dtype=jnp.float32) * 2.0
    targets = (jax.random.uniform(k2, (2, 4, 16, 16)) > 0.5).astype(jnp.float32)

    out = bce_with_logits_loss_smoothing(logits, targets, smoothing=0.1)
    out = jax.block_until_ready(out)

    ref = _reference(logits, targets, smoothing=0.1)
    assert jnp.allclose(out, ref, atol=1e-5, rtol=1e-5), (out, ref)
    print("KERNEL_OK")
</pallas_src>

<mosaic_0001>
module attributes {stable_mosaic.version = 11 : i64} {
  func.func @_bce_smooth_sum_kernel(%arg0: i32, %arg1: memref<16x128xf32, #tpu.memory_space<vmem>>, %arg2: memref<16x128xf32, #tpu.memory_space<vmem>>, %arg3: memref<1x1xf32, #tpu.memory_space<vmem>>, %arg4: memref<1x128xf32, #tpu.memory_space<vmem>>) attributes {dimension_semantics = [#tpu.dimension_semantics<arbitrary>], iteration_bounds = array<i64: 1>, scalar_prefetch = 0 : i64, scratch_operands = 1 : i64, tpu.core_type = #tpu.core_type<tc>, window_params = [{transform_indices = @transform_0, window_bounds = array<i64: 16, 128>}, {transform_indices = @transform_1, window_bounds = array<i64: 16, 128>}, {pipeline_mode = #tpu.pipeline_mode<synchronous>, transform_indices = @transform_2, window_bounds = array<i64: 1, 1>}]} {
    %c0_i32 = arith.constant 0 : i32
    %0 = arith.cmpi eq, %arg0, %c0_i32 : i32
    %1 = arith.extui %0 : i1 to i32
    %c0_i32_0 = arith.constant 0 : i32
    %2 = arith.cmpi ne, %1, %c0_i32_0 : i32
    scf.if %2 {
      %cst_14 = arith.constant 0.000000e+00 : f32
      %27 = vector.broadcast %cst_14 : f32 to vector<1x128xf32>
      %c0_15 = arith.constant 0 : index
      %c0_16 = arith.constant 0 : index
      %28 = vector.load %arg4[%c0_15, %c0_16] : memref<1x128xf32, #tpu.memory_space<vmem>>, vector<1x128xf32>
      tpu.vector_store %arg4[%c0_15, %c0_16], %27 {strides = array<i32>} : memref<1x128xf32, #tpu.memory_space<vmem>>, vector<1x128xf32>,
    } else {
    }
    %c0 = arith.constant 0 : index
    %c0_1 = arith.constant 0 : index
    %3 = vector.load %arg1[%c0, %c0_1] : memref<16x128xf32, #tpu.memory_space<vmem>>, vector<16x128xf32>
    %c0_2 = arith.constant 0 : index
    %c0_3 = arith.constant 0 : index
    %4 = vector.load %arg2[%c0_2, %c0_3] : memref<16x128xf32, #tpu.memory_space<vmem>>, vector<16x128xf32>
    %cst = arith.constant 0.899999976 : f32
    %5 = vector.broadcast %cst : f32 to vector<16x128xf32>
    %6 = arith.mulf %4, %5 : vector<16x128xf32>
    %cst_4 = arith.constant 5.000000e-02 : f32
    %7 = vector.broadcast %cst_4 : f32 to vector<16x128xf32>
    %8 = arith.addf %6, %7 : vector<16x128xf32>
    %cst_5 = arith.constant 0.000000e+00 : f32
    %9 = vector.broadcast %cst_5 : f32 to vector<16x128xf32>
    %10 = arith.maximumf %3, %9 : vector<16x128xf32>
    %11 = arith.mulf %3, %8 : vector<16x128xf32>
    %12 = arith.subf %10, %11 : vector<16x128xf32>
    %13 = math.absf %3 : vector<16x128xf32>
    %cst_6 = arith.constant 0.000000e+00 : f32
    %14 = vector.broadcast %cst_6 : f32 to vector<16x128xf32>
    %15 = arith.subf %14, %13 : vector<16x128xf32>
    %16 = math.exp %15 : vector<16x128xf32>
    %17 = math.log1p %16 : vector<16x128xf32>
    %18 = arith.addf %12, %17 : vector<16x128xf32>
    %c0_7 = arith.constant 0 : index
    %c0_8 = arith.constant 0 : index
    %19 = vector.load %arg4[%c0_7, %c0_8] : memref<1x128xf32, #tpu.memory_space<vmem>>, vector<1x128xf32>
    %cst_9 = arith.constant dense<0.000000e+00> : vector<128xf32>
    %20 = vector.multi_reduction <add>, %18, %cst_9 [0] : vector<16x128xf32> to vector<128xf32>
    %21 = vector.shape_cast %20 : vector<128xf32> to vector<1x128xf32>
    %22 = arith.addf %19, %21 : vector<1x128xf32>
    %c0_10 = arith.constant 0 : index
    %c0_11 = arith.constant 0 : index
    %23 = vector.load %arg4[%c0_10, %c0_11] : memref<1x128xf32, #tpu.memory_space<vmem>>, vector<1x128xf32>
    tpu.vector_store %arg4[%c0_10, %c0_11], %22 {strides = array<i32>} : memref<1x128xf32, #tpu.memory_space<vmem>>, vector<1x128xf32>,
    %c0_i32_12 = arith.constant 0 : i32
    %24 = arith.cmpi eq, %arg0, %c0_i32_12 : i32
    %25 = arith.extui %24 : i1 to i32
    %c0_i32_13 = arith.constant 0 : i32
    %26 = arith.cmpi ne, %25, %c0_i32_13 : i32
    scf.if %26 {
      %c0_14 = arith.constant 0 : index
      %c0_15 = arith.constant 0 : index
      %27 = vector.load %arg4[%c0_14, %c0_15] : memref<1x128xf32, #tpu.memory_space<vmem>>, vector<1x128xf32>
      %cst_16 = arith.constant dense<0.000000e+00> : vector<1xf32>
      %28 = vector.multi_reduction <add>, %27, %cst_16 [1] : vector<1x128xf32> to vector<1xf32>
      %29 = vector.shape_cast %28 : vector<1xf32> to vector<1x1xf32>
      %c0_17 = arith.constant 0 : index
      %c0_18 = arith.constant 0 : index
      %30 = vector.load %arg3[%c0_17, %c0_18] : memref<1x1xf32, #tpu.memory_space<vmem>>, vector<1x1xf32>
      tpu.vector_store %arg3[%c0_17, %c0_18], %29 {strides = array<i32>} : memref<1x1xf32, #tpu.memory_space<vmem>>, vector<1x1xf32>,
    } else {
    }
    return
  }
  func.func @transform_0(%arg0: i32) -> (i32, i32) {
    %c0_i32 = arith.constant 0 : i32
    %c0_i32_0 = arith.constant 0 : i32
    return %arg0, %c0_i32 : i32, i32
  }
  func.func @transform_1(%arg0: i32) -> (i32, i32) {
    %c0_i32 = arith.constant 0 : i32
    %c0_i32_0 = arith.constant 0 : i32
    return %arg0, %c0_i32 : i32, i32
  }
  func.func @transform_2(%arg0: i32) -> (i32, i32) {
    %c0_i32 = arith.constant 0 : i32
    %c0_i32_0 = arith.constant 0 : i32
    %c0_i32_1 = arith.constant 0 : i32
    return %c0_i32, %c0_i32_0 : i32, i32
  }
}

</mosaic_0001>

<bundles_post_ra>
// kernel: tpu_custom_call.1
= control target key start
LH: loop header
LB: loop body
LE: loop exit
PB: predicated region body
PF: predicated region fallthrough
CT: control target
= control target key end

     0   :  { %7 = vsyncpa [#allocation4], 0  ;;  %s266_s0 = inlined_call_operand.hbm [shape: f32[16,128], index: 0, kind: input, shape index: {}]   ;;  %s267_s1 = inlined_call_operand.hbm [shape: f32[16,128], index: 1, kind: input, shape index: {}]   ;;  %s268_s2 = inlined_call_operand.hbm [shape: f32[1,1], index: 2, kind: output, shape index: {}]  }
   0x1   :  { %8 = vsyncpa [#allocation7], 0 }
   0x2   :  { %9 = vsyncpa [#allocation5], 0  ;;  %s209_s9 = smov [#allocation3]   ;;  %s137_s13 = scalar_lea.hbm %s266_s0, 256 }
   0x3   :  { %s15_s10 = sshll.u32 %s209_s9, 4  ;;  %p138_p0 = scmp.ne.s32.totalorder %s266_s0, %s137_s13  ;;  %s16_s10 = int_to_ptr.vmem [resolvable:$true] %s15_s10 }
   0x4   :  { %p141_p1 = scmp.lt.u32.totalorder %s137_s13, %s266_s0 }
   0x6   :  { %p143_p2 = pnand %p141_p1, %p138_p0 }
   0x8   :  { %146 = shalt.err (!%p143_p2)
}
   0x9   :  { %s147_s18 = scalar_lea.vmem %s16_s10, 256  ;;  %p152_p4 = scmp.lt.s32.totalorder %s16_s10, %s16_s10 }
   0xa   :  { %p148_p3 = scmp.ne.s32.totalorder %s16_s10, %s147_s18  ;;  %p153_p5 = scmp.lt.s32.totalorder %s147_s18, %s147_s18 }
   0xc   :  { %p154_p6 = por %p153_p5, %p152_p4 }
   0xe   :  { %p155_p7 = pnand %p154_p6, %p148_p3 }
  0x10   :  { %158 = shalt.err (!%p155_p7)
}
  0x11   :  { %s210_s19 = smov 128   ;;  %s211_s20 = smov 8  }
  0x12   :  { %21 = dma.hbm_to_vmem [thread:$0]  %s266_s0, 256, %s16_s10, [#allocation4], %s210_s19, %s210_s19, %s211_s20  }
  0x13   :  { %s212_s23 = smov [#allocation6]   ;;  %s159_s27 = scalar_lea.hbm %s267_s1, 256 }
  0x14   :  { %s27_s24 = sshll.u32 %s212_s23, 4  ;;  %p160_p8 = scmp.ne.s32.totalorder %s267_s1, %s159_s27  ;;  %s28_s24 = int_to_ptr.vmem [resolvable:$true] %s27_s24 }
  0x15   :  { %p163_p9 = scmp.lt.u32.totalorder %s159_s27, %s267_s1 }
  0x17   :  { %p165_p10 = pnand %p163_p9, %p160_p8 }
  0x19   :  { %168 = shalt.err (!%p165_p10)
}
  0x1a   :  { %s169_s4 = scalar_lea.vmem %s28_s24, 256  ;;  %p174_p12 = scmp.lt.s32.totalorder %s28_s24, %s28_s24 }
  0x1b   :  { %p170_p11 = scmp.ne.s32.totalorder %s28_s24, %s169_s4  ;;  %p175_p13 = scmp.lt.s32.totalorder %s169_s4, %s169_s4 }
  0x1d   :  { %p176_p0 = por %p175_p13, %p174_p12 }
  0x1f   :  { %p177_p1 = pnand %p176_p0, %p170_p11 }
  0x21   :  { %180 = shalt.err (!%p177_p1)
}
  0x22   :  { %33 = dma.hbm_to_vmem [thread:$0]  %s267_s1, 256, %s28_s24, [#allocation7], %s210_s19, %s210_s19, %s211_s20  }
  0x23   :  { %203 = dma.done.wait [#allocation4], 256  }
  0x24   :  { %204 = vsyncadd [#allocation4], 4294967040 }
  0x25   :  { %205 = dma.done.wait [#allocation7], 256  }
  0x26   :  { %206 = vsyncadd [#allocation7], 4294967040  ;;  %v213_v0 = vmov 0.0   ;;  %v45_v1 = vld [vmem:[#allocation3] sm:$0xff]  ;;  %v46_v2 = vld [vmem:[#allocation3 + $0x8] sm:$0xff]  ;;  %vm101_vm2 = vcmask 1040384  }
  0x27   :  { %44 = vst [vmem:[#allocation2] sm:$0x1] %v213_v0  ;;  %v59_v3 = vand.u32 2147483647, %v45_v1  ;;  %v60_v4 = vand.u32 2147483647, %v46_v2 }
  0x28   :  { %v47_v9 = vld [vmem:[#allocation6] sm:$0xff]  ;;  %v48_v10 = vld [vmem:[#allocation6 + $0x8] sm:$0xff]  ;;  %v53_v22 = vmax.f32 %v45_v1, 0.0  ;;  %v54_v26 = vmax.f32 %v46_v2, 0.0  ;;  %s214_s1 = smov [#allocation8]   ;;  %vm105_vm3 = vcmask 0  }
  0x29   :  { %v61_v5 = vsub.f32 0.0, %v59_v3  ;;  %v62_v6 = vsub.f32 0.0, %v60_v4  ;;  %v49_v13 = vmul.f32 0.9, %v47_v9  ;;  %v50_v15 = vmul.f32 0.9, %v48_v10 }
  0x2a   :  { %s113_s6 = sshll.u32 %s214_s1, 4  ;;  %s114_s6 = int_to_ptr.vmem [resolvable:$true] %s113_s6 }
  0x2b   :  { %v63_v7 = vmul.f32 1.442695, %v61_v5  ;;  %v65_v8 = vmul.f32 1.442695, %v62_v6  ;;  %v51_v18 = vadd.f32 0.05, %v49_v13  ;;  %p186_p3 = scmp.lt.s32.totalorder %s114_s6, %s114_s6 }
  0x2c   :  { %v52_v20 = vadd.f32 0.05, %v50_v15  ;;  %s181_s7 = scalar_lea.vmem %s114_s6, 16  ;;  %s185_s8 = scalar_lea.vmem %s114_s6, 32 }
  0x2d   :  { %129 = vpow2.f32 %v63_v7  ;;  %v55_v23 = vmul.f32 %v51_v18, %v45_v1  ;;  %p182_p2 = scmp.ne.s32.totalorder %s114_s6, %s181_s7  ;;  %p187_p4 = scmp.lt.s32.totalorder %s185_s8, %s181_s7 }
  0x2e   :  { %131 = vpow2.f32 %v65_v8  ;;  %v56_v27 = vmul.f32 %v52_v20, %v46_v2  ;;  %v87_v47 = vld [vmem:[#allocation2] sm:$0x1] }
  0x2f   :  { %v57_v31 = vsub.f32 %v53_v22, %v55_v23  ;;  %p188_p5 = por %p187_p4, %p186_p3 }
  0x30   :  { %v58_v34 = vsub.f32 %v54_v26, %v56_v27 }
  0x31   :  { %p189_p6 = pnand %p188_p5, %p182_p2 }
  0x37   :  { %v130_v11 = vpop.eup %129 }
  0x38   :  { %v132_v12 = vpop.eup %131  ;;  %v67_v14 = vadd.f32 1.0, %v130_v11  ;;  %v70_v17 = vmul.f32 -0.5, %v130_v11  ;;  %v73_v24 = vand.u32 2147483647, %v130_v11 }
  0x39   :  { %v76_v16 = vadd.f32 1.0, %v132_v12  ;;  %v79_v19 = vmul.f32 -0.5, %v132_v12  ;;  %v82_v28 = vand.u32 2147483647, %v132_v12 }
  0x3a   :  { %133 = vlog2.f32 %v67_v14  ;;  %v71_v21 = vadd.f32 1.0, %v70_v17  ;;  %vm74_vm0 = vcmp.lt.f32.partialorder %v73_v24, 0.0004427343 }
  0x3b   :  { %135 = vlog2.f32 %v76_v16  ;;  %v80_v25 = vadd.f32 1.0, %v79_v19  ;;  %vm83_vm1 = vcmp.lt.f32.partialorder %v82_v28, 0.0004427343 }
  0x3c   :  { %v72_v29 = vmul.f32 %v130_v11, %v71_v21 }
  0x3d   :  { %v81_v32 = vmul.f32 %v132_v12, %v80_v25 }
  0x44   :  { %v134_v30 = vpop.eup %133 }
  0x45   :  { %v136_v33 = vpop.eup %135  ;;  %v69_v35 = vmul.f32 0.6931472, %v134_v30 }
  0x46   :  { %v78_v36 = vmul.f32 0.6931472, %v136_v33 }
  0x47   :  { %v75_v37 = vsel %vm74_vm0, %v72_v29, %v69_v35 }
  0x48   :  { %v84_v38 = vsel %vm83_vm1, %v81_v32, %v78_v36  ;;  %v85_v39 = vadd.f32 %v75_v37, %v57_v31 }
  0x49   :  { %v86_v40 = vadd.f32 %v84_v38, %v58_v34 }
  0x4b   :  { %v88_v41 = vadd.f32 %v86_v40, %v85_v39 }
  0x4d   :  { %v89_v42 = vrot.slane %v88_v41, 4 }
  0x4f   :  { %v90_v43 = vadd.f32 %v89_v42, %v88_v41 }
  0x51   :  { %v91_v44 = vrot.slane %v90_v43, 2 }
  0x53   :  { %v92_v45 = vadd.f32 %v91_v44, %v90_v43 }
  0x55   :  { %v93_v46 = vrot.slane %v92_v45, 1 }
  0x57   :  { %v94_v48 = vadd.f32 %v93_v46, %v92_v45 }
  0x59   :  { %v95_v49 = vadd.f32 %v94_v48, %v87_v47 }
  0x5b   :  { %96 = vst [vmem:[#allocation2] sm:$0x1] %v95_v49 }
  0x62   :  { %v100_v50 = vld [vmem:[#allocation2] sm:$0x1] }
  0x63   :  { %v102_v51 = vsel %vm101_vm2, %v100_v50, 0.0 }
  0x64   :  { %103 = vadd.xlane.f32.xlu0 %v102_v51 }
  0xf1   :  { %v104_v52 = vpop.xlane.xlu0 %103 }
  0xf2   :  { %106 = vst.msk [vmem:[#allocation8] sm:$0x1] %vm105_vm3, %v104_v52 }
  0xf3   :  { %192 = shalt.err (!%p189_p6)
}
  0xf4   :  { %s193_s11 = scalar_lea.hbm %s268_s2, 16 }
  0xf5   :  { %p194_p7 = scmp.ne.s32.totalorder %s268_s2, %s193_s11  ;;  %p197_p8 = scmp.lt.u32.totalorder %s193_s11, %s268_s2 }
  0xf7   :  { %p199_p9 = pnand %p197_p8, %p194_p7 }
  0xf9   :  { %202 = shalt.err (!%p199_p9)
}
  0xfa   :  { %116 = dma.vmem_to_hbm [thread:$0]  %s114_s6, 16, %s268_s2, [#allocation5]  }
  0xfb   :  { %207 = dma.done.wait [#allocation5], 16  }
  0xfc   :  { %208 = vsyncadd [#allocation5], 4294967280 }
  0xfd   :  { %120 = vsyncpa [#allocation4], 1 }
  0xfe   :  { %121 = vsyncpa [#allocation7], 1 }
  0xff   :  { %122 = vsyncpa [#allocation5], 1 }

</bundles_post_ra>
